<compile_context>
chip_gen: v6e
topology: v6e:2x2x1
jax: 0.10.0
libtpu: 0.0.40
codegen_flags: <defaults>
</compile_context>

<pallas_src>
from functools import partial

import jax
import jax.numpy as jnp
from jax.experimental import pallas as pl
from jax.experimental.pallas import tpu as pltpu


def _l2norm_kernel(x_ref, w_ref, o_ref, *, eps):
    # x_ref / o_ref: (1, C, T) block — one batch element, one spatial tile.
    # w_ref:         (1, C, 1) per-channel scale, broadcast over lanes.
    x = x_ref[...].astype(jnp.float32)                   # (1, C, T)
    ssq = jnp.sum(x * x, axis=1, keepdims=True)          # (1, 1, T) channel reduction
    denom = jnp.maximum(jnp.sqrt(ssq), eps)              # F.normalize eps guard
    xn = x / denom                                       # broadcast over channels
    w = w_ref[...].astype(jnp.float32)                   # (1, C, 1)
    o_ref[...] = (w * xn).astype(o_ref.dtype)


def _choose_hw_tile(hw, c, itemsize):
    """Largest lane-dense tile (multiple of 128) dividing H*W whose (C, T) block
    stays well inside VMEM with double-buffered in+out; fall back to the full
    extent for ragged spatial sizes (a full-extent block dim is always legal)."""
    if hw % 128 != 0:
        return hw
    # ~4 MiB per block -> in+out double-buffered stays ~16 MiB << scoped VMEM default.
    budget = 4 << 20
    t = 128
    for cand in (256, 512, 1024, 2048, 4096, 8192):
        if hw % cand == 0 and c * cand * itemsize <= budget:
            t = cand
    return t


@partial(jax.jit, static_argnames=("eps",))
def l2norm(x, weight, eps=1e-12):
    """Pallas TPU implementation of L2Norm.forward for NCHW inputs."""
    N, C, H, W = x.shape
    HW = H * W
    xr = x.reshape(N, C, HW)                    # channels -> sublanes, spatial -> lanes
    w3 = weight.reshape(1, C, 1)
    T = _choose_hw_tile(HW, C, x.dtype.itemsize)
    grid = (N, HW // T)

    out = pl.pallas_call(
        partial(_l2norm_kernel, eps=eps),
        out_shape=jax.ShapeDtypeStruct((N, C, HW), x.dtype),
        grid_spec=pltpu.PrefetchScalarGridSpec(
            num_scalar_prefetch=0,
            grid=grid,
            in_specs=[
                pl.BlockSpec((1, C, T), lambda n, j: (n, 0, j)),
                pl.BlockSpec((1, C, 1), lambda n, j: (0, 0, 0)),
            ],
            out_specs=pl.BlockSpec((1, C, T), lambda n, j: (n, 0, j)),
        ),
        compiler_params=pltpu.CompilerParams(
            dimension_semantics=("parallel", "parallel")),
    )(xr, w3)
    return out.reshape(N, C, H, W)


def l2norm_ref(x, weight, eps=1e-12):
    # Pure-JAX reference mirroring F.normalize(x, dim=1) * weight[None,:,None,None].
    norm = jnp.sqrt(jnp.sum(x * x, axis=1, keepdims=True))
    xn = x / jnp.maximum(norm, eps)
    return weight[None, :, None, None] * xn


if __name__ == "__main__":
    key = jax.random.PRNGKey(0)
    xkey, wkey = jax.random.split(key)

    N, C, H, W = 2, 4, 16, 16
    scale = 20.0
    x = jax.random.normal(xkey, (N, C, H, W), jnp.float32)
    # The module initializes weight to a constant `scale`; perturb it per channel so
    # the per-channel broadcast path is actually exercised by the check.
    weight = scale + 0.1 * jax.random.normal(wkey, (C,), jnp.float32)

    out = l2norm(x, weight)
    out = jax.block_until_ready(out)

    ref = l2norm_ref(x, weight)
    assert out.shape == (N, C, H, W)
    assert bool(jnp.allclose(out, ref, rtol=1e-5, atol=1e-5)), \
        float(jnp.max(jnp.abs(out - ref)))
    print("KERNEL_OK")
</pallas_src>

<mosaic_0001>
module attributes {stable_mosaic.version = 11 : i64} {
  func.func @_l2norm_kernel(%arg0: i32, %arg1: i32, %arg2: memref<1x4x256xf32, #tpu.memory_space<vmem>>, %arg3: memref<1x4x1xf32, #tpu.memory_space<vmem>>, %arg4: memref<1x4x256xf32, #tpu.memory_space<vmem>>) attributes {dimension_semantics = [#tpu.dimension_semantics<parallel>, #tpu.dimension_semantics<parallel>], iteration_bounds = array<i64: 2, 1>, scalar_prefetch = 0 : i64, scratch_operands = 0 : i64, tpu.core_type = #tpu.core_type<tc>, window_params = [{transform_indices = @transform_0, window_bounds = array<i64: 1, 4, 256>}, {pipeline_mode = #tpu.pipeline_mode<synchronous>, transform_indices = @transform_1, window_bounds = array<i64: 1, 4, 1>}, {transform_indices = @transform_2, window_bounds = array<i64: 1, 4, 256>}]} {
    %c0 = arith.constant 0 : index
    %c0_0 = arith.constant 0 : index
    %c0_1 = arith.constant 0 : index
    %0 = vector.load %arg2[%c0, %c0_0, %c0_1] : memref<1x4x256xf32, #tpu.memory_space<vmem>>, vector<1x4x256xf32>
    %1 = arith.mulf %0, %0 : vector<1x4x256xf32>
    %cst = arith.constant dense<0.000000e+00> : vector<1x256xf32>
    %2 = vector.multi_reduction <add>, %1, %cst [1] : vector<1x4x256xf32> to vector<1x256xf32>
    %3 = vector.shape_cast %2 : vector<1x256xf32> to vector<1x1x256xf32>
    %4 = math.sqrt %3 : vector<1x1x256xf32>
    %cst_2 = arith.constant 9.99999996E-13 : f32
    %5 = vector.broadcast %cst_2 : f32 to vector<1x1x256xf32>
    %6 = arith.maximumf %4, %5 : vector<1x1x256xf32>
    %7 = vector.broadcast %6 : vector<1x1x256xf32> to vector<1x4x256xf32>
    %8 = arith.divf %0, %7 : vector<1x4x256xf32>
    %c0_3 = arith.constant 0 : index
    %c0_4 = arith.constant 0 : index
    %c0_5 = arith.constant 0 : index
    %9 = vector.load %arg3[%c0_3, %c0_4, %c0_5] : memref<1x4x1xf32, #tpu.memory_space<vmem>>, vector<1x4x1xf32>
    %10 = vector.broadcast %9 : vector<1x4x1xf32> to vector<1x4x256xf32>
    %11 = arith.mulf %10, %8 : vector<1x4x256xf32>
    %c0_6 = arith.constant 0 : index
    %c0_7 = arith.constant 0 : index
    %c0_8 = arith.constant 0 : index
    %12 = vector.load %arg4[%c0_6, %c0_7, %c0_8] : memref<1x4x256xf32, #tpu.memory_space<vmem>>, vector<1x4x256xf32>
    tpu.vector_store %arg4[%c0_6, %c0_7, %c0_8], %11 {strides = array<i32>} : memref<1x4x256xf32, #tpu.memory_space<vmem>>, vector<1x4x256xf32>,
    return
  }
  func.func @transform_0(%arg0: i32, %arg1: i32) -> (i32, i32, i32) {
    %c0_i32 = arith.constant 0 : i32
    %c0_i32_0 = arith.constant 0 : i32
    return %arg0, %c0_i32, %arg1 : i32, i32, i32
  }
  func.func @transform_1(%arg0: i32, %arg1: i32) -> (i32, i32, i32) {
    %c0_i32 = arith.constant 0 : i32
    %c0_i32_0 = arith.constant 0 : i32
    %c0_i32_1 = arith.constant 0 : i32
    %c0_i32_2 = arith.constant 0 : i32
    return %c0_i32, %c0_i32_0, %c0_i32_1 : i32, i32, i32
  }
  func.func @transform_2(%arg0: i32, %arg1: i32) -> (i32, i32, i32) {
    %c0_i32 = arith.constant 0 : i32
    %c0_i32_0 = arith.constant 0 : i32
    return %arg0, %c0_i32, %arg1 : i32, i32, i32
  }
}

</mosaic_0001>

<bundles_post_ra>
// kernel: l2norm.1
= control target key start
LH: loop header
LB: loop body
LE: loop exit
PB: predicated region body
PF: predicated region fallthrough
CT: control target
= control target key end

     0   :  { %s413_s9 = smov 0   ;;  %s415_s10 = smov 0   ;;  %s456_s0 = inlined_call_operand.vmem [shape: f32[2,4,256], index: 0, kind: input, shape index: {}]   ;;  %s457_s1 = inlined_call_operand.vmem [shape: f32[1,4,1], index: 1, kind: input, shape index: {}]   ;;  %s458_s2 = inlined_call_operand.vmem [shape: f32[2,4,256], index: 2, kind: output, shape index: {}]  }
   0x1   :  { %s417_s11 = smov 0  }
   0x2 LB: > { %s24_s12 = sadd.s32 1, %s391_s10  ;;  %p332_p0 = scmp.ge.s32.totalorder %s395_s11, 1  ;;  %s395_s11 = sphi %s417_s11, %s12_s11   ;;  %s391_s10 = sphi %s415_s10, %s460_s10   ;;  %s387_s9 = sphi %s413_s9, %s459_s9  }
   0x3   : > { %p26_p1 = scmp.ge.s32.totalorder %s24_s12, 2  ;;  %p133_p2 = scmp.lt.s32.totalorder %s395_s11, 3 }
   0x5   : > { %s462_s12 = smov (%p26_p1, %s24_s12), 0  ;;  %p134_p3 = pnand %p332_p0, %p133_p2 }
   0x6   : > { %p164_p4 = scmp.lt.s32.totalorder (!%p134_p3), %s387_s9, 1 }
   0x7   : > { %137 = sbr.rel (%p134_p3) target bundleno = 143 (0x8f), region = 28 }
   0xc   : > { %v225_v0 = vld [vmem:[%s457_s1] sm:$0xf]  ;;  %v397_v1 = vmov 0   ;;  %s464_s9 = smov (!%p164_p4, %s387_s9), 1  ;;  %vm188_vm0 = vcmask 1043456  }
   0xd   : > { %366 = vset.pattern.permute.xlu0 %v397_v1  ;;  %s339_s15 = sshll.u32 %s464_s9, 3 }
   0xe   : > { %228 = vperm.xlu0 %366, %v225_v0   ;;  %s171_s18 = scalar_lea.vmem %s456_s0, %s339_s15  ;;  %s181_s21 = scalar_lea.vmem %s458_s2, %s339_s15 }
   0xf   : > { %v183_v2 = vld [vmem:[%s171_s18] sm:$0xff] }
  0x10   : > { %v184_v3 = vmul.f32 %v183_v2, %v183_v2 }
  0x12   : > { %v186_v4 = vcombine.high %v184_v3, %v184_v3  ;;  %v189_v5 = vsel %vm188_vm0, %v184_v3, 0.0 }
  0x13   : > { %v190_v7 = vrot.slane %v189_v5, 4 }
  0x14   : > { %v196_v6 = vsel %vm188_vm0, %v186_v4, 0.0 }
  0x15   : > { %v197_v8 = vrot.slane %v196_v6, 4  ;;  %v191_v9 = vadd.f32 %v190_v7, %v189_v5 }
  0x17   : > { %v198_v10 = vadd.f32 %v197_v8, %v196_v6  ;;  %v192_v11 = vrot.slane %v191_v9, 2 }
  0x19   : > { %v199_v12 = vrot.slane %v198_v10, 2  ;;  %v193_v13 = vadd.f32 %v192_v11, %v191_v9 }
  0x1b   : > { %v200_v14 = vadd.f32 %v199_v12, %v198_v10  ;;  %v194_v15 = vrot.slane %v193_v13, 1 }
  0x1d   : > { %v201_v16 = vrot.slane %v200_v14, 1  ;;  %v195_v17 = vadd.f32 %v194_v15, %v193_v13 }
  0x1f   : > { %v202_v18 = vadd.f32 %v201_v16, %v200_v14  ;;  %367 = vrsqrt.f32 %v195_v17  ;;  %vm205_vm1 = vcmp.eq.f32.partialorder %v195_v17, inf  ;;  %v208_v23 = vand.u32 2147483648, %v195_v17 }
  0x20   : > { %vm207_vm3 = vcmp.eq.f32.partialorder %v195_v17, 0.0 }
  0x21   : > { %369 = vrsqrt.f32 %v202_v18  ;;  %vm212_vm2 = vcmp.eq.f32.partialorder %v202_v18, inf  ;;  %v215_v24 = vand.u32 2147483648, %v202_v18  ;;  %vm214_vm4 = vcmp.eq.f32.partialorder %v202_v18, 0.0 }
  0x2c   : > { %v368_v19 = vpop.eup %367 }
  0x2d   : > { %v204_v21 = vmul.f32 %v368_v19, %v195_v17 }
  0x2e   : > { %v370_v20 = vpop.eup %369 }
  0x2f   : > { %v211_v22 = vmul.f32 %v370_v20, %v202_v18  ;;  %v206_v25 = vsel %vm205_vm1, %v195_v17, %v204_v21 }
  0x30   : > { %v209_v27 = vsel %vm207_vm3, %v208_v23, %v206_v25 }
  0x31   : > { %v213_v26 = vsel %vm212_vm2, %v202_v18, %v211_v22  ;;  %v217_v29 = vmax.f32 %v209_v27, 1e-12 }
  0x32   : > { %v216_v28 = vsel %vm214_vm4, %v215_v24, %v213_v26 }
  0x33   : > { %v218_v30 = vmax.f32 %v216_v28, 1e-12 }
  0x35   : > { %v221_v31 = vcombine.low %v217_v29, %v218_v30 }
  0x37   : > { %371 = vrcp.f32 %v221_v31 }
  0x44   : > { %v372_v32 = vpop.eup %371 }
  0x45   : > { %v224_v33 = vmul.f32 %v372_v32, %v183_v2 }
  0x47   : > { %v232_v34 = vcombine.high %v224_v33, %v224_v33 }
  0x89   : > { %v229_v35 = vpop.permute.xlu0 %228 }
  0x8a   : > { %v234_v36 = vmul.f32 %v229_v35, %v224_v33  ;;  %v235_v37 = vmul.f32 %v232_v34, %v229_v35 }
  0x8c   : > { %v238_v38 = vcombine.low %v234_v36, %v235_v37 }
  0x8e   : > { %240 = vst [vmem:[%s181_s21] sm:$0xff] %v238_v38 }
  0x8f PF: > { %s12_s11 = sadd.s32 1, %s395_s11   ;;  %s459_s9 = smov %s391_s10 }
  0x90   : > { %p9_p5 = scmp.ge.s32.totalorder %s12_s11, 4   ;;  %s460_s10 = smov %s462_s12 }
  0x92   :  { %11 = sbr.rel (!%p9_p5) target bundleno = 2 (0x2), region = 58 }

</bundles_post_ra>
